<compile_context>
chip_gen: v7x
topology: tpu7x:2x2x1
jax: 0.10.0
libtpu: 0.0.40
codegen_flags: <defaults>
</compile_context>

<pallas_src>
import math
import functools

import jax
import jax.numpy as jnp
from jax import lax
from jax.experimental import pallas as pl
from jax.experimental.pallas import tpu as pltpu


# ---------------------------------------------------------------------------
# Filter construction (mirrors GaussianSmoothing.__init__)
# ---------------------------------------------------------------------------
def _gaussian_taps_1d(size, std):
    """Normalized 1D Gaussian taps as plain Python floats (trace-time constants)."""
    mean = (size - 1) / 2.0
    g = [math.exp(-(((i - mean) / std) ** 2) / 2.0) for i in range(size)]
    s = sum(g)
    return tuple(v / s for v in g)


def _gaussian_kernel_2d(channels, kernel_size, sigma):
    """Full (C, 1, Kh, Kw) buffer exactly like the torch module (used for the reference)."""
    ks = [kernel_size, kernel_size] if isinstance(kernel_size, int) else list(kernel_size)
    sg = [sigma, sigma] if isinstance(sigma, (int, float)) else list(sigma)
    kernel = jnp.array(1.0, dtype=jnp.float32)
    grids = jnp.meshgrid(*[jnp.arange(s, dtype=jnp.float32) for s in ks], indexing="ij")
    for size, std, mgrid in zip(ks, sg, grids):
        mean = (size - 1) / 2.0
        kernel = kernel * (1.0 / (std * math.sqrt(2 * math.pi))
                           * jnp.exp(-(((mgrid - mean) / std) ** 2) / 2.0))
    kernel = kernel / jnp.sum(kernel)
    return jnp.broadcast_to(kernel[None, None], (channels, 1, ks[0], ks[1]))


# ---------------------------------------------------------------------------
# Pallas kernel
# ---------------------------------------------------------------------------
def _smooth_kernel(x_ref, o_ref, *, wy, wx, Ho, Wo):
    # x_ref: VMEM (1, C, H, W)  -- one full image (all channels fused in the block)
    # o_ref: VMEM (1, C, Ho, Wo)
    # wy/wx: Python float tuples (baked-in separable Gaussian taps)
    x = x_ref[0].astype(jnp.float32)                       # (C, H, W)

    # Vertical pass (offsets along H only -> sublane-direction shifts).
    tv = wy[0] * x[:, 0:Ho, :]
    for ki in range(1, len(wy)):
        tv = tv + wy[ki] * x[:, ki:ki + Ho, :]             # (C, Ho, W)

    # Horizontal pass (offsets along W -> lane-direction shifts), window to Wo.
    acc = wx[0] * tv[:, :, 0:Wo]
    for kj in range(1, len(wx)):
        acc = acc + wx[kj] * tv[:, :, kj:kj + Wo]          # (C, Ho, Wo)

    o_ref[0] = acc.astype(o_ref.dtype)


def gaussian_smoothing(x, kernel_size, sigma):
    """x: (N, C, H, W). Depthwise valid 2D Gaussian blur, identical semantics to the module."""
    N, C, H, W = x.shape
    ks = [kernel_size, kernel_size] if isinstance(kernel_size, int) else list(kernel_size)
    sg = [sigma, sigma] if isinstance(sigma, (int, float)) else list(sigma)
    Kh, Kw = int(ks[0]), int(ks[1])                        # supports rectangular kernels
    Ho, Wo = H - Kh + 1, W - Kw + 1

    wy = _gaussian_taps_1d(Kh, float(sg[0]))               # separable taps, trace-time floats
    wx = _gaussian_taps_1d(Kw, float(sg[1]))

    kernel_fn = functools.partial(_smooth_kernel, wy=wy, wx=wx, Ho=Ho, Wo=Wo)

    return pl.pallas_call(
        kernel_fn,
        out_shape=jax.ShapeDtypeStruct((N, C, Ho, Wo), x.dtype),
        grid_spec=pltpu.PrefetchScalarGridSpec(
            num_scalar_prefetch=0,
            grid=(N,),                                     # one image per step; channels fused
            in_specs=[pl.BlockSpec((1, C, H, W), lambda n: (n, 0, 0, 0))],
            out_specs=pl.BlockSpec((1, C, Ho, Wo), lambda n: (n, 0, 0, 0)),
        ),
        compiler_params=pltpu.CompilerParams(
            dimension_semantics=("parallel",)),            # even N shards across v7x's 2 TCs
    )(x)


# ---------------------------------------------------------------------------
# Reference (same semantics as F.conv2d(input, weight, groups=C))
# ---------------------------------------------------------------------------
def _reference(x, weight):
    C = x.shape[1]
    return lax.conv_general_dilated(
        x.astype(jnp.float32), weight.astype(jnp.float32),
        window_strides=(1, 1), padding="VALID",
        dimension_numbers=("NCHW", "OIHW", "NCHW"),
        feature_group_count=C).astype(x.dtype)


if __name__ == "__main__":
    N, C, H, W = 2, 4, 16, 16
    kernel_size, sigma = 3, 1.0

    key = jax.random.PRNGKey(0)
    x = jax.random.normal(key, (N, C, H, W), dtype=jnp.float32)

    out = gaussian_smoothing(x, kernel_size, sigma)
    out = jax.block_until_ready(out)

    weight = _gaussian_kernel_2d(C, kernel_size, sigma)    # (C, 1, 3, 3), torch-equivalent buffer
    ref = jax.block_until_ready(_reference(x, weight))

    assert out.shape == (N, C, H - kernel_size + 1, W - kernel_size + 1), out.shape
    assert jnp.allclose(out, ref, atol=1e-5, rtol=1e-5), float(jnp.max(jnp.abs(out - ref)))

    print("KERNEL_OK")
</pallas_src>

<mosaic_0001>
module attributes {stable_mosaic.version = 11 : i64} {
  func.func @_smooth_kernel(%arg0: i32, %arg1: memref<1x4x16x16xf32, #tpu.memory_space<vmem>>, %arg2: memref<1x4x14x14xf32, #tpu.memory_space<vmem>>) attributes {dimension_semantics = [#tpu.dimension_semantics<parallel>], iteration_bounds = array<i64: 2>, scalar_prefetch = 0 : i64, scratch_operands = 0 : i64, tpu.core_type = #tpu.core_type<tc>, window_params = [{transform_indices = @transform_0, window_bounds = array<i64: 1, 4, 16, 16>}, {transform_indices = @transform_1, window_bounds = array<i64: 1, 4, 14, 14>}]} {
    %c0 = arith.constant 0 : index
    %c0_0 = arith.constant 0 : index
    %c0_1 = arith.constant 0 : index
    %c0_2 = arith.constant 0 : index
    %0 = vector.load %arg1[%c0, %c0_0, %c0_1, %c0_2] : memref<1x4x16x16xf32, #tpu.memory_space<vmem>>, vector<1x4x16x16xf32>
    %1 = vector.shape_cast %0 : vector<1x4x16x16xf32> to vector<4x16x16xf32>
    %2 = vector.extract_strided_slice %1 {offsets = [0, 0, 0], sizes = [4, 14, 16], strides = [1, 1, 1]} : vector<4x16x16xf32> to vector<4x14x16xf32>
    %cst = arith.constant 0.274068624 : f32
    %3 = vector.broadcast %cst : f32 to vector<4x14x16xf32>
    %4 = arith.mulf %3, %2 : vector<4x14x16xf32>
    %5 = vector.extract_strided_slice %1 {offsets = [0, 1, 0], sizes = [4, 14, 16], strides = [1, 1, 1]} : vector<4x16x16xf32> to vector<4x14x16xf32>
    %cst_3 = arith.constant 0.451862752 : f32
    %6 = vector.broadcast %cst_3 : f32 to vector<4x14x16xf32>
    %7 = arith.mulf %6, %5 : vector<4x14x16xf32>
    %8 = arith.addf %4, %7 : vector<4x14x16xf32>
    %9 = vector.extract_strided_slice %1 {offsets = [0, 2, 0], sizes = [4, 14, 16], strides = [1, 1, 1]} : vector<4x16x16xf32> to vector<4x14x16xf32>
    %cst_4 = arith.constant 0.274068624 : f32
    %10 = vector.broadcast %cst_4 : f32 to vector<4x14x16xf32>
    %11 = arith.mulf %10, %9 : vector<4x14x16xf32>
    %12 = arith.addf %8, %11 : vector<4x14x16xf32>
    %13 = vector.extract_strided_slice %12 {offsets = [0, 0, 0], sizes = [4, 14, 14], strides = [1, 1, 1]} : vector<4x14x16xf32> to vector<4x14x14xf32>
    %cst_5 = arith.constant 0.274068624 : f32
    %14 = vector.broadcast %cst_5 : f32 to vector<4x14x14xf32>
    %15 = arith.mulf %14, %13 : vector<4x14x14xf32>
    %16 = vector.extract_strided_slice %12 {offsets = [0, 0, 1], sizes = [4, 14, 14], strides = [1, 1, 1]} : vector<4x14x16xf32> to vector<4x14x14xf32>
    %cst_6 = arith.constant 0.451862752 : f32
    %17 = vector.broadcast %cst_6 : f32 to vector<4x14x14xf32>
    %18 = arith.mulf %17, %16 : vector<4x14x14xf32>
    %19 = arith.addf %15, %18 : vector<4x14x14xf32>
    %20 = vector.extract_strided_slice %12 {offsets = [0, 0, 2], sizes = [4, 14, 14], strides = [1, 1, 1]} : vector<4x14x16xf32> to vector<4x14x14xf32>
    %cst_7 = arith.constant 0.274068624 : f32
    %21 = vector.broadcast %cst_7 : f32 to vector<4x14x14xf32>
    %22 = arith.mulf %21, %20 : vector<4x14x14xf32>
    %23 = arith.addf %19, %22 : vector<4x14x14xf32>
    %c0_8 = arith.constant 0 : index
    %c0_9 = arith.constant 0 : index
    %c0_10 = arith.constant 0 : index
    %c0_11 = arith.constant 0 : index
    %24 = vector.load %arg2[%c0_8, %c0_9, %c0_10, %c0_11] : memref<1x4x14x14xf32, #tpu.memory_space<vmem>>, vector<1x4x14x14xf32>
    %25 = vector.shape_cast %24 : vector<1x4x14x14xf32> to vector<4x14x14xf32>
    %26 = vector.shape_cast %23 : vector<4x14x14xf32> to vector<1x4x14x14xf32>
    tpu.vector_store %arg2[%c0_8, %c0_9, %c0_10, %c0_11], %26 {strides = array<i32>} : memref<1x4x14x14xf32, #tpu.memory_space<vmem>>, vector<1x4x14x14xf32>,
    return
  }
  func.func @transform_0(%arg0: i32) -> (i32, i32, i32, i32) {
    %c0_i32 = arith.constant 0 : i32
    %c0_i32_0 = arith.constant 0 : i32
    %c0_i32_1 = arith.constant 0 : i32
    %c0_i32_2 = arith.constant 0 : i32
    return %arg0, %c0_i32, %c0_i32_0, %c0_i32_1 : i32, i32, i32, i32
  }
  func.func @transform_1(%arg0: i32) -> (i32, i32, i32, i32) {
    %c0_i32 = arith.constant 0 : i32
    %c0_i32_0 = arith.constant 0 : i32
    %c0_i32_1 = arith.constant 0 : i32
    %c0_i32_2 = arith.constant 0 : i32
    return %arg0, %c0_i32, %c0_i32_0, %c0_i32_1 : i32, i32, i32, i32
  }
}

</mosaic_0001>

<bundles_post_ra>
// kernel: tpu_custom_call.1
= control target key start
LH: loop header
LB: loop body
LE: loop exit
PB: predicated region body
PF: predicated region fallthrough
CT: control target
= control target key end

     0   :  { %6 = vsyncpa [#allocation3], 0  ;;  %s713_s0 = inlined_call_operand.hbm [shape: f32[2,4,16,16], index: 0, kind: input, shape index: {}]   ;;  %s714_s1 = inlined_call_operand.vmem [shape: f32[2,4,14,14], index: 1, kind: output, shape index: {}]  }
   0x1   :  { %8 = vsyncpa [#allocation3 + $0x1], 0  ;;  %s546_s6 = smov 0   ;;  %s548_s7 = smov 0  }
   0x2   :  { %s550_s8 = smov 0   ;;  %s552_s9 = smov 0  }
   0x3 LB: > { %s565_s10 = sadd.s32 4294967295, %s529_s9   ;;  %s568_s11 = sadd.s32 1, %s529_s9   ;;  %s529_s9 = sphi %s552_s9, %s721_s9   ;;  %s525_s8 = sphi %s550_s8, %s720_s8   ;;  %s521_s7 = sphi %s548_s7, %s719_s7   ;;  %s517_s6 = sphi %s546_s6, %s718_s6  }
   0x4   : > { %s18_s12 = ssub.s32 %s529_s9, %s568_s11  ;;  %s21_s13 = sadd.s32 1, %s525_s8 }
   0x5   : > { %p19_p0 = scmp.eq.s32.totalorder %s18_s12, 0  ;;  %p28_p1 = scmp.ne.s32.totalorder %s525_s8, %s521_s7 }
   0x6   : > { %p29_p2 = scmp.eq.s32.totalorder %s529_s9, 0  ;;  %p34_p3 = scmp.ne.s32.totalorder %s521_s7, %s517_s6 }
   0x7   : > { %s578_s14 = scalar_select %p19_p0, %s525_s8, %s21_s13  }
   0x8   : > { %p30_p4 = por %p29_p2, %p28_p1  ;;  %p35_p5 = scmp.eq.s32.totalorder %s565_s10, 0 }
   0x9   : > { %p428_p6 = scmp.lt.s32.totalorder %s529_s9, 2  ;;  %s84_s16 = sand.u32 1, %s525_s8  }
   0xa   : > { %p582_p7 = por %p35_p5, %p34_p3  ;;  %s411_s17 = sshll.u32 %s84_s16, 6 }
   0xb   : > { %s420_s18 = sshll.u32 %s529_s9, 10  ;;  %s88_s22 = scalar_lea.vmem [#allocation2], %s411_s17 }
   0xc   : > { %s591_s21 = scalar_lea.hbm %s713_s0, %s420_s18  ;;  %s95_s23 = sshll.u32 %s88_s22, 4  ;;  %s593_s23 = int_to_ptr.vmem [resolvable:$true] %s95_s23 }
   0xd   : > { %p595_p8 = pnand %p428_p6, %p30_p4  ;;  %s600_s25 = scalar_lea.sflag [#allocation3], %s84_s16 }
   0xe   : > { %s465_s26 = scalar_lea.hbm %s591_s21, 1024  ;;  %s470_s29 = scalar_lea.hbm %s713_s0, 2048 }
   0xf   : > { %p466_p10 = scmp.ne.s32.totalorder %s591_s21, %s465_s26  ;;  %p467_p11 = pneg %p595_p8 }
  0x10   : > { %p471_p0 = scmp.lt.u32.totalorder %s591_s21, %s713_s0  ;;  %p472_p1 = scmp.lt.u32.totalorder %s470_s29, %s465_s26 }
  0x11   : > { %p468_p12 = pnand %p467_p11, %p466_p10  ;;  %p474_p3 = scmp.lt.u32.totalorder %s465_s26, %s591_s21 }
  0x12   : > { %p473_p2 = por %p472_p1, %p471_p0 }
  0x13   : > { %p469_p13 = pneg %p468_p12 }
  0x14   : > { %p475_p4 = por %p474_p3, %p473_p2 }
  0x16   : > { %p476_p5 = pnand %p475_p4, %p469_p13 }
  0x18   : > { %479 = shalt.err (!%p476_p5)
}
  0x19   : > { %s480_s3 = scalar_lea.vmem %s593_s23, 1024  ;;  %s531_s4 = smov [#allocation2]  }
  0x1a   : > { %p481_p6 = scmp.ne.s32.totalorder %s593_s23, %s480_s3  ;;  %s485_s5 = sshll.u32 %s531_s4, 4  ;;  %s486_s5 = int_to_ptr.vmem [resolvable:$false] %s485_s5 }
  0x1b   : > { %s487_s6 = scalar_lea.vmem %s486_s5, 2048  ;;  %p488_p9 = scmp.lt.s32.totalorder %s593_s23, %s486_s5 }
  0x1c   : > { %p483_p10 = pnand %p481_p6, %p467_p11  ;;  %p489_p0 = scmp.lt.s32.totalorder %s487_s6, %s480_s3 }
  0x1e   : > { %p484_p12 = pneg %p483_p10  ;;  %p490_p1 = por %p489_p0, %p488_p9 }
  0x20   : > { %p491_p2 = pnand %p490_p1, %p484_p12 }
  0x22   : > { %494 = shalt.err (!%p491_p2)
}
  0x23   : > { %s532_s12 = smov 128   ;;  %s533_s13 = smov 8  }
  0x24   : > { %427 = dma.hbm_to_vmem [thread:$0]  (!%p595_p8), %s591_s21, 1024, %s593_s23, %s600_s25, %s532_s12, %s532_s12, %s533_s13  }
  0x25   : > { %p103_p11 = scmp.lt.s32.totalorder %s529_s9, 3  ;;  %p717_p13 = scmp.ge.s32.totalorder %s529_s9, 1 }
  0x27   : > { %p104_p3 = pnand %p717_p13, %p103_p11 }
  0x28   : > { %s109_s16 = sand.u32 (!%p104_p3), 1, %s521_s7  }
  0x29   : > { %107 = sbr.rel (%p104_p3) target bundleno = 207 (0xcf), region = 24  ;;  %s415_s17 = sshll.u32 (!%p104_p3), %s109_s16, 6 }
  0x2a   : > { %s110_s18 = scalar_lea.sflag (!%p104_p3), [#allocation3], %s109_s16  ;;  %s632_s19 = scalar_lea.vmem (!%p104_p3), [#allocation2], %s415_s17 }
  0x30   : > { %512 = dma.done.wait (%p582_p7), %s110_s18, 1024  }
  0x31   : > { %514 = vsyncadd (%p582_p7), %s110_s18, 4294966272  ;;  %v140_v0 = vld [vmem:[%s632_s19 + $0x18] sm:$0xff]  ;;  %v138_v1 = vld [vmem:[%s632_s19 + $0x8] sm:$0xff]  ;;  %vm169_vm0 = vcmask 1046528   ;;  %vm206_vm1 = vcmask 1045504   ;;  %s534_s9 = smov 127  }
  0x32   : > { %v142_v2 = vld [vmem:[%s632_s19 + $0x28] sm:$0xff]  ;;  %v641_v3 = vmul.f32 0.27406862, %v140_v0  ;;  %v643_v4 = vmul.f32 0.45186275, %v140_v0  ;;  %v137_v12 = vld [vmem:[%s632_s19] sm:$0xff] }
  0x33   : > { %v146_v5 = vmul.f32 0.27406862, %v138_v1  ;;  %v154_v6 = vmul.f32 0.45186275, %v138_v1  ;;  %v150_v7 = vmul.f32 0.27406862, %v142_v2 }
  0x34   : > { %v158_v8 = vmul.f32 0.45186275, %v142_v2  ;;  %v174_v9 = vrot.slane %v643_v4, 1  ;;  %v211_v10 = vrot.slane %v641_v3, 2  ;;  %v144_v13 = vld [vmem:[%s632_s19 + $0x38] sm:$0xff]  ;;  %v141_v18 = vld [vmem:[%s632_s19 + $0x20] sm:$0xff] }
  0x35   : > { %v208_v11 = vrot.slane %v146_v5, 2  ;;  %v171_v14 = vrot.slane %v154_v6, 1  ;;  %v214_v16 = vrot.slane %v150_v7, 2  ;;  %v145_v17 = vmul.f32 0.27406862, %v137_v12  ;;  %v143_v39 = vld [vmem:[%s632_s19 + $0x30] sm:$0xff] }
  0x36   : > { %v177_v15 = vrot.slane %v158_v8, 1  ;;  %v193_v19 = vadd.f32 %v174_v9, %v641_v3  ;;  %v153_v20 = vmul.f32 0.45186275, %v137_v12  ;;  %v152_v21 = vmul.f32 0.27406862, %v144_v13  ;;  %v139_v43 = vld [vmem:[%s632_s19 + $0x10] sm:$0xff] }
  0x37   : > { %v160_v22 = vmul.f32 0.45186275, %v144_v13  ;;  %v191_v23 = vadd.f32 %v171_v14, %v146_v5  ;;  %v207_v25 = vrot.slane %v145_v17, 2  ;;  %v149_v26 = vmul.f32 0.27406862, %v141_v18  ;;  %s535_s15 = smov 126  }
  0x38   : > { %v195_v24 = vadd.f32 %v177_v15, %v150_v7  ;;  %v230_v27 = vadd.f32 %v211_v10, %v193_v19  ;;  %v170_v28 = vrot.slane %v153_v20, 1  ;;  %v217_v30 = vrot.slane %v152_v21, 2  ;;  %p132_p7 = scmp.lt.s32.totalorder %s565_s10, 1 }
  0x39   : > { %v180_v29 = vrot.slane %v160_v22, 1  ;;  %v228_v31 = vadd.f32 %v208_v11, %v191_v23  ;;  %v209_v33 = vsel %vm206_vm1, %v207_v25, %v208_v11  ;;  %v157_v34 = vmul.f32 0.45186275, %v141_v18 }
  0x3a   : > { %v232_v32 = vadd.f32 %v214_v16, %v195_v24  ;;  %v246_v35 = vmul.f32 0.45186275, %v230_v27  ;;  %v172_v36 = vsel %vm169_vm0, %v170_v28, %v171_v14  ;;  %v213_v38 = vrot.slane %v149_v26, 2  ;;  %s723_s10 = smov (!%p132_p7, %s565_s10), 1 }
  0x3b   : > { %v197_v37 = vadd.f32 %v180_v29, %v152_v21  ;;  %v244_v40 = vmul.f32 0.45186275, %v228_v31  ;;  %v190_v41 = vadd.f32 %v172_v36, %v145_v17  ;;  %v176_v42 = vrot.slane %v157_v34, 1  ;;  %s421_s20 = sshll.u32 %s723_s10, 6 }
  0x3c   : > { %265 = vrot.lane.b32.xlu1 %v246_v35, %s534_s9  ;;  %v248_v44 = vmul.f32 0.45186275, %v232_v32  ;;  %v215_v46 = vsel %vm206_vm1, %v213_v38, %v214_v16  ;;  %v151_v47 = vmul.f32 0.27406862, %v143_v39  ;;  %v159_v50 = vmul.f32 0.45186275, %v143_v39  ;;  %s682_s23 = scalar_lea.vmem %s714_s1, %s421_s20 }
  0x3d   : > { %v234_v45 = vadd.f32 %v217_v30, %v197_v37  ;;  %261 = vrot.lane.b32.xlu0 %v244_v40, %s534_s9  ;;  %v227_v48 = vadd.f32 %v209_v33, %v190_v41  ;;  %v178_v49 = vsel %vm169_vm0, %v176_v42, %v177_v15  ;;  %v147_v51 = vmul.f32 0.27406862, %v139_v43 }
  0x3e   : > { %v194_v52 = vadd.f32 %v178_v49, %v149_v26  ;;  %v216_v53 = vrot.slane %v151_v47, 2  ;;  %v155_v54 = vmul.f32 0.45186275, %v139_v43  ;;  %v179_v56 = vrot.slane %v159_v50, 1 }
  0x3f   : > { %v243_v55 = vmul.f32 0.45186275, %v227_v48  ;;  %v210_v57 = vrot.slane %v147_v51, 2  ;;  %v250_v58 = vmul.f32 0.45186275, %v234_v45  ;;  %vm333_vm2 = vcmask 111616  }
  0x40   : > { %269 = vrot.lane.b32.xlu1 %v248_v44, %s534_s9  ;;  %v231_v59 = vadd.f32 %v215_v46, %v194_v52  ;;  %v173_v60 = vrot.slane %v155_v54, 1  ;;  %v181_v61 = vsel %vm169_vm0, %v179_v56, %v180_v29  ;;  %v218_v62 = vsel %vm206_vm1, %v216_v53, %v217_v30 }
  0x41   : > { %259 = vrot.lane.b32.xlu0 %v243_v55, %s534_s9  ;;  %v196_v0 = vadd.f32 %v181_v61, %v151_v47  ;;  %v212_v2 = vsel %vm206_vm1, %v210_v57, %v211_v10  ;;  %v236_v6 = vmul.f32 0.27406862, %v228_v31  ;;  %v235_v4 = vmul.f32 0.27406862, %v227_v48 }
  0x42   : > { %v247_v63 = vmul.f32 0.45186275, %v231_v59  ;;  %v175_v1 = vsel %vm169_vm0, %v173_v60, %v174_v9  ;;  %v238_v3 = vmul.f32 0.27406862, %v230_v27  ;;  %v240_v10 = vmul.f32 0.27406862, %v232_v32 }
  0x43   : > { %v192_v5 = vadd.f32 %v175_v1, %v147_v51  ;;  %v233_v7 = vadd.f32 %v218_v62, %v196_v0  ;;  %v239_v13 = vmul.f32 0.27406862, %v231_v59  ;;  %v242_v14 = vmul.f32 0.27406862, %v234_v45 }
  0x44   : > { %273 = vrot.lane.b32.xlu1 %v250_v58, %s534_s9  ;;  %vm331_vm3 = vcmask 113664  }
  0x45   : > { %267 = vrot.lane.b32.xlu0 %v247_v63, %s534_s9  ;;  %v229_v8 = vadd.f32 %v212_v2, %v192_v5  ;;  %v249_v11 = vmul.f32 0.45186275, %v233_v7  ;;  %v241_v15 = vmul.f32 0.27406862, %v233_v7 }
  0x47   : > { %v245_v12 = vmul.f32 0.45186275, %v229_v8  ;;  %v237_v9 = vmul.f32 0.27406862, %v229_v8 }
  0x48   : > { %301 = vrot.lane.b32.xlu1 %v236_v6, %s535_s15 }
  0x49   : > { %271 = vrot.lane.b32.xlu0 %v249_v11, %s534_s9 }
  0x4c   : > { %263 = vrot.lane.b32.xlu1 %v245_v12, %s534_s9 }
  0x4d   : > { %299 = vrot.lane.b32.xlu0 %v235_v4, %s535_s15 }
  0x50   : > { %305 = vrot.lane.b32.xlu1 %v238_v3, %s535_s15 }
  0x51   : > { %303 = vrot.lane.b32.xlu0 %v237_v9, %s535_s15 }
  0x54   : > { %309 = vrot.lane.b32.xlu1 %v240_v10, %s535_s15 }
  0x55   : > { %307 = vrot.lane.b32.xlu0 %v239_v13, %s535_s15 }
  0x58   : > { %313 = vrot.lane.b32.xlu1 %v242_v14, %s535_s15 }
  0x59   : > { %311 = vrot.lane.b32.xlu0 %v241_v15, %s535_s15 }
  0xae   : > { %v266_v16 = vpop.permute.xlu1 %265 }
  0xaf   : > { %v262_v17 = vpop.permute.xlu0 %261  ;;  %v286_v30 = vadd.f32 %v266_v16, %v238_v3 }
  0xb0   : > { %v284_v22 = vadd.f32 %v262_v17, %v236_v6 }
  0xb2   : > { %v270_v18 = vpop.permute.xlu1 %269 }
  0xb3   : > { %v260_v19 = vpop.permute.xlu0 %259  ;;  %v288_v36 = vadd.f32 %v270_v18, %v240_v10 }
  0xb4   : > { %v283_v26 = vadd.f32 %v260_v19, %v235_v4 }
  0xb6   : > { %v274_v20 = vpop.permute.xlu1 %273 }
  0xb7   : > { %v268_v21 = vpop.permute.xlu0 %267  ;;  %v290_v42 = vadd.f32 %v274_v20, %v242_v14 }
  0xb8   : > { %v287_v37 = vadd.f32 %v268_v21, %v239_v13 }
  0xba   : > { %v302_v23 = vpop.permute.xlu1 %301 }
  0xbb   : > { %v324_v24 = vadd.f32 %v302_v23, %v284_v22  ;;  %v272_v25 = vpop.permute.xlu0 %271 }
  0xbc   : > { %v289_v43 = vadd.f32 %v272_v25, %v241_v15 }
  0xbd   : > { %334 = vst.msk [vmem:[%s682_s23 + $0x8] sm:$0x3f] %vm333_vm2, %v324_v24 }
  0xbe   : > { %v264_v27 = vpop.permute.xlu1 %263 }
  0xbf   : > { %v300_v28 = vpop.permute.xlu0 %299  ;;  %v285_v31 = vadd.f32 %v264_v27, %v237_v9 }
  0xc0   : > { %v323_v29 = vadd.f32 %v300_v28, %v283_v26 }
  0xc2   : > { %332 = vst.msk [vmem:[%s682_s23] sm:$0xff] %vm331_vm3, %v323_v29  ;;  %v306_v32 = vpop.permute.xlu1 %305 }
  0xc3   : > { %v326_v33 = vadd.f32 %v306_v32, %v286_v30  ;;  %v304_v34 = vpop.permute.xlu0 %303 }
  0xc4   : > { %v325_v35 = vadd.f32 %v304_v34, %v285_v31 }
  0xc5   : > { %336 = vst.msk [vmem:[%s682_s23 + $0x18] sm:$0x3f] %vm333_vm2, %v326_v33 }
  0xc6   : > { %335 = vst.msk [vmem:[%s682_s23 + $0x10] sm:$0xff] %vm331_vm3, %v325_v35  ;;  %v310_v38 = vpop.permute.xlu1 %309 }
  0xc7   : > { %v328_v39 = vadd.f32 %v310_v38, %v288_v36  ;;  %v308_v40 = vpop.permute.xlu0 %307 }
  0xc8   : > { %v327_v41 = vadd.f32 %v308_v40, %v287_v37 }
  0xc9   : > { %338 = vst.msk [vmem:[%s682_s23 + $0x28] sm:$0x3f] %vm333_vm2, %v328_v39 }
  0xca   : > { %337 = vst.msk [vmem:[%s682_s23 + $0x20] sm:$0xff] %vm331_vm3, %v327_v41  ;;  %v314_v44 = vpop.permute.xlu1 %313 }
  0xcb   : > { %v330_v45 = vadd.f32 %v314_v44, %v290_v42  ;;  %v312_v46 = vpop.permute.xlu0 %311 }
  0xcc   : > { %v329_v47 = vadd.f32 %v312_v46, %v289_v43 }
  0xcd   : > { %340 = vst.msk [vmem:[%s682_s23 + $0x38] sm:$0x3f] %vm333_vm2, %v330_v45 }
  0xce   : > { %339 = vst.msk [vmem:[%s682_s23 + $0x30] sm:$0xff] %vm331_vm3, %v329_v47 }
  0xcf PF: > { %p11_p8 = scmp.ge.s32.totalorder %s568_s11, 4   ;;  %s718_s6 = smov %s521_s7 }
  0xd0   : > { %s719_s7 = smov %s525_s8  ;;  %s720_s8 = smov %s578_s14 }
  0xd1   : > { %s721_s9 = smov %s568_s11  ;;  %13 = sbr.rel (!%p11_p8) target bundleno = 3 (0x3), region = 64 }
  0xd8   :  { %362 = vsyncpa [#allocation3], 1 }
  0xd9   :  { %364 = vsyncpa [#allocation3 + $0x1], 1 }

</bundles_post_ra>
